<compile_context>
chip_gen: v5e
topology: v5e:2x2
jax: 0.10.0
libtpu: 0.0.40
codegen_flags: <defaults>
</compile_context>

<pallas_src>
import jax
import jax.numpy as jnp
from jax import lax
from jax.experimental import pallas as pl
from jax.experimental.pallas import tpu as pltpu

LN_EPS = 1e-5                    # torch.nn.LayerNorm default eps
_MLP_TILE = 256                  # lane sub-tile for the in-kernel MLP
_ROW_GROUP = 8                   # rows packed per store (one f32 vreg of sublanes)
_MAX_ROW_TILE = 256              # cap on rows per output block
_BLOCK_BYTES_BUDGET = 4 << 20    # per output block (x2 for double buffering)


def _round_up(x, m):
    return ((x + m - 1) // m) * m


# --------------------------------------------------------------------------
# Fused kernel: folded cpb MLP (once per head) + Toeplitz row-group writer.
# --------------------------------------------------------------------------
def _dpb_kernel(coef_ref, pcols_ref, w2row_ref, out_ref, rev_sc):
    # coef_ref  : SMEM (4,)  f32 = [a, 2b, c + eps, n - 1]   (LayerNorm var poly)
    # pcols_ref : VMEM (dim, 3) f32, cols = [(w1-mw)*gamma, (b1-mb)*gamma, beta]
    # w2row_ref : VMEM (1, dim) f32  -- this head's row of Linear(dim,heads).weight
    # out_ref   : VMEM (TR, n)  block of bias[h]
    # rev_sc    : VMEM (8, Lp) f32 scratch; every row holds rev (identical rows)
    r = pl.program_id(1)
    tr, n = out_ref.shape
    lp = rev_sc.shape[-1]

    # ---- Phase 1: per-head folded MLP, computed once on the head's first
    # row tile, in 256-lane sub-tiles so hn/act stay in vregs.
    @pl.when(r == 0)
    def _():
        a = coef_ref[0]
        two_b = coef_ref[1]
        c_eps = coef_ref[2]
        offset = coef_ref[3]                       # = n - 1
        wg = pcols_ref[:, 0:1]                     # (dim, 1)
        bg = pcols_ref[:, 1:2]                     # (dim, 1)
        beta = pcols_ref[:, 2:3]                   # (dim, 1)
        w2row = w2row_ref[...]                     # (1, dim)
        for t in range(lp // _MLP_TILE):           # static, small trip count
            lane = t * _MLP_TILE + lax.broadcasted_iota(
                jnp.int32, (1, _MLP_TILE), 1)
            pos = offset - lane.astype(jnp.float32)            # reversed positions
            # LayerNorm folded analytically (exact): var = a*pos^2 + 2b*pos + c.
            inv = lax.rsqrt((a * pos + two_b) * pos + c_eps)   # (1, tile)
            hn = (pos * wg + bg) * inv + beta                  # (dim, tile)
            act = hn * jax.nn.sigmoid(hn)                      # SiLU
            row = jnp.dot(w2row, act,
                          preferred_element_type=jnp.float32)  # (1, tile)
            # Replicate across all 8 sublanes so phase 2 reads a ready-made
            # (8, Lp) broadcast straight from the scratch.
            rev_sc[:, t * _MLP_TILE:(t + 1) * _MLP_TILE] = jnp.broadcast_to(
                row, (_ROW_GROUP, _MLP_TILE))

    # ---- Phase 2: Toeplitz expansion, 8 rows per store via strided lane roll.
    #   bias[h, i, j] = rev[(n - 1 - i) + j]
    bcast = rev_sc[...]                            # (8, Lp), all rows identical
    i0_block = r * tr
    n_groups = tr // _ROW_GROUP

    def group_body(g, carry):
        i0 = i0_block + g * _ROW_GROUP             # first output row of the group
        base = (n - 1) - i0                        # rev index of column 0, sublane 0
        # Sublane s must be rolled by (-base + s)  (mod Lp):
        #   rolled[s, j] = rev[(base - s + j) mod Lp]
        shift0 = lax.rem(jnp.int32(2 * lp) - base, jnp.int32(lp))
        rolled = pltpu.roll(bcast, shift0, 1, stride=1, stride_axis=0)
        row0 = pl.multiple_of(g * _ROW_GROUP, _ROW_GROUP)
        out_ref[pl.ds(row0, _ROW_GROUP), :] = rolled[:, :n].astype(out_ref.dtype)
        return carry

    lax.fori_loop(0, n_groups, group_body, 0, unroll=min(8, n_groups))


# --------------------------------------------------------------------------
# Module-equivalent wrapper.
# --------------------------------------------------------------------------
def dynamic_position_bias(n, params, dtype=jnp.float32):
    """Replicates DynamicPositionBias.forward(n, device, dtype) -> (heads, n, n)."""
    w1 = params["w1"].reshape(-1).astype(jnp.float32)       # (dim,)  Linear(1,dim).weight[:,0]
    b1 = params["b1"].reshape(-1).astype(jnp.float32)       # (dim,)  Linear(1,dim).bias
    gamma = params["gamma"].reshape(-1).astype(jnp.float32)  # LayerNorm.weight
    beta = params["beta"].reshape(-1).astype(jnp.float32)    # LayerNorm.bias
    w2 = params["w2"].astype(jnp.float32)                    # (heads, dim), torch layout
    heads, dim = w2.shape

    # Fold Linear(1,dim) + LayerNorm statistics analytically (exact):
    #   h = pos*w1 + b1  =>  mean = pos*mw + mb,  var = a*pos^2 + 2b*pos + c.
    mw = jnp.mean(w1)
    mb = jnp.mean(b1)
    w1c = w1 - mw
    b1c = b1 - mb
    a = jnp.mean(w1c * w1c)
    b = jnp.mean(w1c * b1c)
    c = jnp.mean(b1c * b1c)
    coef = jnp.stack([a, 2.0 * b, c + LN_EPS,
                      jnp.float32(n - 1)]).astype(jnp.float32)        # (4,)
    pcols = jnp.stack([w1c * gamma, b1c * gamma, beta], axis=-1)      # (dim, 3)
    w2r = w2.reshape(heads, 1, dim)                                   # per-head row blocks

    # rev table width: 2n-1 relative positions, minimally padded to the MLP tile.
    lp = _round_up(2 * n - 1, _MLP_TILE)

    # Row tile: multiple of 8, capped so the double-buffered (TR, n) output
    # block stays within ~8 MiB (safe under v5e/v6e/v7x scoped-VMEM defaults).
    itemsize = jnp.dtype(dtype).itemsize
    tr_cap = max(_ROW_GROUP,
                 (_BLOCK_BYTES_BUDGET // max(1, n * itemsize))
                 // _ROW_GROUP * _ROW_GROUP)
    tr = min(_MAX_ROW_TILE, tr_cap, _round_up(n, _ROW_GROUP))

    grid = (heads, pl.cdiv(n, tr))
    return pl.pallas_call(
        _dpb_kernel,
        out_shape=jax.ShapeDtypeStruct((heads, n, n), dtype),
        grid=grid,
        in_specs=[
            pl.BlockSpec(memory_space=pltpu.MemorySpace.SMEM),        # coef scalars
            pl.BlockSpec((dim, 3), lambda h, r: (0, 0)),              # folded per-dim params
            pl.BlockSpec((None, 1, dim), lambda h, r: (h, 0, 0)),     # this head's w2 row
        ],
        out_specs=pl.BlockSpec((None, tr, n), lambda h, r: (h, r, 0)),
        scratch_shapes=[pltpu.VMEM((_ROW_GROUP, lp), jnp.float32)],
        compiler_params=pltpu.CompilerParams(
            dimension_semantics=("parallel", "arbitrary")),
    )(coef, pcols, w2r)


def init_params(dim, heads, key):
    """Deterministic synthetic init (shapes match the torch module)."""
    k1, k2, k3, k4, k5 = jax.random.split(key, 5)
    w1 = jax.random.normal(k1, (dim,), jnp.float32) * 0.5              # Linear(1,dim).weight[:,0]
    b1 = jax.random.normal(k2, (dim,), jnp.float32) * 0.1              # Linear(1,dim).bias
    gamma = 1.0 + 0.1 * jax.random.normal(k4, (dim,), jnp.float32)     # LayerNorm.weight
    beta = 0.1 * jax.random.normal(k5, (dim,), jnp.float32)            # LayerNorm.bias
    w2 = jax.random.normal(k3, (heads, dim), jnp.float32) / jnp.sqrt(dim)  # Linear(dim,heads,bias=False).weight
    return {"w1": w1, "b1": b1, "gamma": gamma, "beta": beta, "w2": w2}


def _reference(n, params, dtype=jnp.float32):
    """Pure-JAX reference of the torch forward, for a sanity check."""
    pos = jnp.arange(-n + 1, n, dtype=jnp.float32).reshape(-1, 1)        # (L, 1)
    h = pos * params["w1"].reshape(1, -1) + params["b1"].reshape(1, -1)  # Linear(1,dim)
    mean = jnp.mean(h, axis=-1, keepdims=True)
    var = jnp.mean((h - mean) ** 2, axis=-1, keepdims=True)
    h = (h - mean) / jnp.sqrt(var + LN_EPS) * params["gamma"].reshape(1, -1) \
        + params["beta"].reshape(1, -1)
    h = h * jax.nn.sigmoid(h)                                            # SiLU
    pos_out = h @ params["w2"].T                                         # (L, heads)
    i = jnp.arange(n)
    idx = i[:, None] - i[None, :] + (n - 1)
    return jnp.transpose(pos_out[idx], (2, 0, 1)).astype(dtype)


if __name__ == "__main__":
    dim, heads = 32, 4
    params = init_params(dim, heads, jax.random.PRNGKey(0))

    # Small shape consistent with the module's forward(n, ...).
    for n in (8, 24):
        bias = dynamic_position_bias(n, params, dtype=jnp.float32)
        bias = jax.block_until_ready(bias)
        ref = _reference(n, params)
        assert bias.shape == (heads, n, n), bias.shape
        assert jnp.allclose(bias, ref, atol=1e-4, rtol=1e-4), \
            f"mismatch vs reference at n={n}"

    print("KERNEL_OK")
</pallas_src>

<mosaic_0001>
module attributes {stable_mosaic.version = 11 : i64} {
  func.func @_dpb_kernel(%arg0: i32, %arg1: i32, %arg2: memref<4xf32, #tpu.memory_space<smem>>, %arg3: memref<32x3xf32, #tpu.memory_space<vmem>>, %arg4: memref<1x1x32xf32, #tpu.memory_space<vmem>>, %arg5: memref<1x8x8xf32, #tpu.memory_space<vmem>>, %arg6: memref<8x256xf32, #tpu.memory_space<vmem>>) attributes {dimension_semantics = [#tpu.dimension_semantics<parallel>, #tpu.dimension_semantics<arbitrary>], iteration_bounds = array<i64: 4, 1>, scalar_prefetch = 0 : i64, scratch_operands = 1 : i64, tpu.core_type = #tpu.core_type<tc>, window_params = [{transform_indices = @transform_0, window_bounds = array<i64: 4>}, {pipeline_mode = #tpu.pipeline_mode<synchronous>, transform_indices = @transform_1, window_bounds = array<i64: 32, 3>}, {transform_indices = @transform_2, window_bounds = array<i64: 1, 1, 32>}, {transform_indices = @transform_3, window_bounds = array<i64: 1, 8, 8>}]} {
    %c0_i32 = arith.constant 0 : i32
    %0 = arith.cmpi eq, %arg1, %c0_i32 : i32
    %1 = arith.extui %0 : i1 to i32
    %c0_i32_0 = arith.constant 0 : i32
    %2 = arith.cmpi ne, %1, %c0_i32_0 : i32
    scf.if %2 {
      %c0_7 = arith.constant 0 : index
      %18 = memref.load %arg2[%c0_7] : memref<4xf32, #tpu.memory_space<smem>>
      %c1 = arith.constant 1 : index
      %19 = memref.load %arg2[%c1] : memref<4xf32, #tpu.memory_space<smem>>
      %c2 = arith.constant 2 : index
      %20 = memref.load %arg2[%c2] : memref<4xf32, #tpu.memory_space<smem>>
      %c3 = arith.constant 3 : index
      %21 = memref.load %arg2[%c3] : memref<4xf32, #tpu.memory_space<smem>>
      %c0_8 = arith.constant 0 : index
      %c0_9 = arith.constant 0 : index
      %22 = vector.load %arg3[%c0_8, %c0_9] : memref<32x3xf32, #tpu.memory_space<vmem>>, vector<32x1xf32>
      %c0_10 = arith.constant 0 : index
      %c1_11 = arith.constant 1 : index
      %23 = vector.load %arg3[%c0_10, %c1_11] : memref<32x3xf32, #tpu.memory_space<vmem>>, vector<32x1xf32>
      %c0_12 = arith.constant 0 : index
      %c2_13 = arith.constant 2 : index
      %24 = vector.load %arg3[%c0_12, %c2_13] : memref<32x3xf32, #tpu.memory_space<vmem>>, vector<32x1xf32>
      %c0_14 = arith.constant 0 : index
      %c0_15 = arith.constant 0 : index
      %c0_16 = arith.constant 0 : index
      %25 = vector.load %arg4[%c0_14, %c0_15, %c0_16] : memref<1x1x32xf32, #tpu.memory_space<vmem>>, vector<1x1x32xf32>
      %26 = vector.shape_cast %25 : vector<1x1x32xf32> to vector<1x32xf32>
      %27 = tpu.iota {dimensions = array<i32: 1>} : vector<1x256xi32>
      %c0_i32_17 = arith.constant 0 : i32
      %28 = vector.broadcast %c0_i32_17 : i32 to vector<1x256xi32>
      %29 = arith.addi %28, %27 : vector<1x256xi32>
      %30 = arith.sitofp %29 : vector<1x256xi32> to vector<1x256xf32>
      %31 = vector.broadcast %21 : f32 to vector<1x256xf32>
      %32 = arith.subf %31, %30 : vector<1x256xf32>
      %33 = vector.broadcast %18 : f32 to vector<1x256xf32>
      %34 = arith.mulf %33, %32 : vector<1x256xf32>
      %35 = vector.broadcast %19 : f32 to vector<1x256xf32>
      %36 = arith.addf %34, %35 : vector<1x256xf32>
      %37 = arith.mulf %36, %32 : vector<1x256xf32>
      %38 = vector.broadcast %20 : f32 to vector<1x256xf32>
      %39 = arith.addf %37, %38 : vector<1x256xf32>
      %40 = math.rsqrt %39 : vector<1x256xf32>
      %41 = vector.broadcast %32 : vector<1x256xf32> to vector<32x256xf32>
      %42 = vector.broadcast %22 : vector<32x1xf32> to vector<32x256xf32>
      %43 = arith.mulf %41, %42 : vector<32x256xf32>
      %44 = vector.broadcast %23 : vector<32x1xf32> to vector<32x256xf32>
      %45 = arith.addf %43, %44 : vector<32x256xf32>
      %46 = vector.broadcast %40 : vector<1x256xf32> to vector<32x256xf32>
      %47 = arith.mulf %45, %46 : vector<32x256xf32>
      %48 = vector.broadcast %24 : vector<32x1xf32> to vector<32x256xf32>
      %49 = arith.addf %47, %48 : vector<32x256xf32>
      %50 = arith.negf %49 : vector<32x256xf32>
      %51 = math.exp %50 : vector<32x256xf32>
      %cst = arith.constant 1.000000e+00 : f32
      %52 = vector.broadcast %cst : f32 to vector<32x256xf32>
      %53 = arith.addf %52, %51 : vector<32x256xf32>
      %54 = arith.divf %52, %53 : vector<32x256xf32>
      %55 = arith.mulf %49, %54 : vector<32x256xf32>
      %cst_18 = arith.constant dense<0.000000e+00> : vector<1x256xf32>
      %56 = tpu.matmul %26, %55, %cst_18 {dimension_numbers = #tpu.dot_dimension_numbers<[1], [0], [0], [1], [0, 0, 1, 1], [], []>} : vector<1x32xf32>, vector<32x256xf32>, vector<1x256xf32> -> vector<1x256xf32>
      %57 = vector.shape_cast %56 : vector<1x256xf32> to vector<1x256xf32>
      %58 = vector.broadcast %57 : vector<1x256xf32> to vector<8x256xf32>
      %c0_19 = arith.constant 0 : index
      %c0_20 = arith.constant 0 : index
      %59 = vector.load %arg6[%c0_19, %c0_20] : memref<8x256xf32, #tpu.memory_space<vmem>>, vector<8x256xf32>
      tpu.vector_store %arg6[%c0_19, %c0_20], %58 {strides = array<i32>} : memref<8x256xf32, #tpu.memory_space<vmem>>, vector<8x256xf32>,
    } else {
    }
    %c0 = arith.constant 0 : index
    %c0_1 = arith.constant 0 : index
    %3 = vector.load %arg6[%c0, %c0_1] : memref<8x256xf32, #tpu.memory_space<vmem>>, vector<8x256xf32>
    %c8_i32 = arith.constant 8 : i32
    %4 = arith.muli %arg1, %c8_i32 : i32
    %c0_i32_2 = arith.constant 0 : i32
    %c8_i32_3 = arith.constant 8 : i32
    %5 = arith.muli %c0_i32_2, %c8_i32_3 : i32
    %6 = arith.addi %4, %5 : i32
    %c7_i32 = arith.constant 7 : i32
    %7 = arith.subi %c7_i32, %6 : i32
    %c512_i32 = arith.constant 512 : i32
    %8 = arith.subi %c512_i32, %7 : i32
    %c256_i32 = arith.constant 256 : i32
    %9 = arith.remsi %8, %c256_i32 : i32
    %10 = tpu.dynamic_rotate %3 by %9 dim 1 {stride = 1 : si32, stride_dimension = 0 : si32} : vector<8x256xf32>, i32 -> vector<8x256xf32>
    %c8_i32_4 = arith.constant 8 : i32
    %11 = arith.muli %c0_i32_2, %c8_i32_4 : i32
    %12 = tpu.assume_multiple %11, 8 : i32
    %13 = vector.extract_strided_slice %10 {offsets = [0, 0], sizes = [8, 8], strides = [1, 1]} : vector<8x256xf32> to vector<8x8xf32>
    %c0_5 = arith.constant 0 : index
    %14 = arith.index_cast %12 : i32 to index
    %c0_6 = arith.constant 0 : index
    %15 = vector.load %arg5[%c0_5, %14, %c0_6] : memref<1x8x8xf32, #tpu.memory_space<vmem>>, vector<1x8x8xf32>
    %16 = vector.shape_cast %15 : vector<1x8x8xf32> to vector<8x8xf32>
    %17 = vector.shape_cast %13 : vector<8x8xf32> to vector<1x8x8xf32>
    tpu.vector_store %arg5[%c0_5, %14, %c0_6], %17 {strides = array<i32>} : memref<1x8x8xf32, #tpu.memory_space<vmem>>, vector<1x8x8xf32>,
    %c1_i32 = arith.constant 1 : i32
    return
  }
  func.func @transform_0(%arg0: i32, %arg1: i32) -> i32 {
    %c0_i32 = arith.constant 0 : i32
    %c0_i32_0 = arith.constant 0 : i32
    return %c0_i32 : i32
  }
  func.func @transform_1(%arg0: i32, %arg1: i32) -> (i32, i32) {
    %c0_i32 = arith.constant 0 : i32
    %c0_i32_0 = arith.constant 0 : i32
    %c0_i32_1 = arith.constant 0 : i32
    return %c0_i32, %c0_i32_0 : i32, i32
  }
  func.func @transform_2(%arg0: i32, %arg1: i32) -> (i32, i32, i32) {
    %c0_i32 = arith.constant 0 : i32
    %c0_i32_0 = arith.constant 0 : i32
    %c0_i32_1 = arith.constant 0 : i32
    return %arg0, %c0_i32, %c0_i32_0 : i32, i32, i32
  }
  func.func @transform_3(%arg0: i32, %arg1: i32) -> (i32, i32, i32) {
    %c0_i32 = arith.constant 0 : i32
    %c0_i32_0 = arith.constant 0 : i32
    return %arg0, %arg1, %c0_i32 : i32, i32, i32
  }
}

</mosaic_0001>

<bundles_post_ra>
// kernel: tpu_custom_call.1
= control target key start
LH: loop header
LB: loop body
LE: loop exit
PB: predicated region body
PF: predicated region fallthrough
CT: control target
= control target key end

     0   :  { %8 = vsyncpa [#allocation5], 0  ;;  %s1231_s0 = inlined_call_operand.vmem [shape: f32[4], index: 0, kind: input, shape index: {}]   ;;  %s1232_s1 = inlined_call_operand.vmem [shape: f32[32,3], index: 1, kind: input, shape index: {}]   ;;  %s1233_s2 = inlined_call_operand.vmem [shape: f32[4,1,32], index: 2, kind: input, shape index: {}]   ;;  %s1234_s3 = inlined_call_operand.hbm [shape: f32[4,8,8], index: 3, kind: output, shape index: {}]  }
   0x1   :  { %9 = vsyncpa [#allocation4], 0 }
   0x2   :  { %11 = vsyncpa [#allocation4 + $0x1], 0  ;;  %s933_s12 = smov 0   ;;  %s935_s13 = smov 0  }
   0x3   :  { %s937_s14 = smov 0   ;;  %s939_s15 = smov 0  }
   0x4   :  { %s941_s16 = smov 0   ;;  %s943_s17 = smov 0  }
   0x5 LB: > { %s668_s18 = sadd.s32 4294967295, %s906_s17   ;;  %s669_s19 = sadd.s32 4294967294, %s906_s17   ;;  %s906_s17 = sphi %s943_s17, %s17_s17   ;;  %s902_s16 = sphi %s941_s16, %s1257_s16   ;;  %s898_s15 = sphi %s939_s15, %s1256_s15   ;;  %s894_s14 = sphi %s937_s14, %s1255_s14   ;;  %s890_s13 = sphi %s935_s13, %s1254_s13   ;;  %s886_s12 = sphi %s933_s12, %s1253_s12  }
   0x6   : > { %s29_s20 = sadd.s32 1, %s902_s16  ;;  %s106_s21 = sadd.s32 1, %s894_s14 }
   0x7   : > { %p31_p0 = scmp.ge.s32.totalorder %s29_s20, 4  ;;  %p116_p1 = scmp.ne.s32.totalorder %s894_s14, %s890_s13 }
   0x8   : > { %p117_p2 = scmp.eq.s32.totalorder %s668_s18, 3  ;;  %p122_p3 = scmp.ne.s32.totalorder %s890_s13, %s886_s12 }
   0x9   : > { %s1259_s20 = smov (%p31_p0, %s29_s20), 0  ;;  %p123_p5 = scmp.eq.s32.totalorder %s669_s19, 3 }
   0xa   : > { %p973_p4 = por %p117_p2, %p116_p1  ;;  %s101_s23 = ssub.s32 %s902_s16, %s1259_s20 }
   0xb   : > { %p670_p6 = scmp.ge.s32.totalorder %s906_s17, 1  ;;  %p104_p7 = scmp.eq.s32.totalorder %s101_s23, 0 }
   0xc   : > { %p980_p8 = por %p123_p5, %p122_p3  ;;  %p130_p9 = scmp.lt.s32.totalorder %s906_s17, 5 }
   0xd   : > { %s986_s25 = scalar_select %p104_p7, %s894_s14, %s106_s21  }
   0xe   : > { %p131_p10 = pnand %p670_p6, %p130_p9  ;;  %p707_p11 = scmp.eq.s32.totalorder %s668_s18, 0 }
   0xf   : > { %s142_s28 = sshll.u32 %s1231_s0, 4  ;;  %s908_s29 = smov [#allocation3]   ;;  %s143_s28 = int_to_ptr.vmem [resolvable:$true] %s142_s28 }
  0x10   : > { %p699_p12 = pneg %p131_p10  ;;  %164 = sbr.rel (%p131_p10) target bundleno = 453 (0x1c5), region = 32 }
  0x12   : > { %p700_p13 = pnand %p707_p11, %p699_p12 }
  0x14   : > { %702 = dma.vmem_to_smem (!%p700_p13), %s143_s28, 16, %s908_s29, [#allocation5]  }
  0x15   : > { %877 = dma.done.wait (%p707_p11), [#allocation5], 16  }
  0x16   : > { %879 = vsyncadd (%p707_p11), [#allocation5], 4294967280 }
  0x17   : > { %171 = sfence }
  0x18   : > { %v202_v0 = vld [vmem:[%s1232_s1 + $0x18] sm:$0xff]  ;;  %v909_v1 = vmov 1   ;;  %v910_v2 = vmov 0   ;;  %v201_v3 = vld [vmem:[%s1232_s1 + $0x10] sm:$0xff]  ;;  %v200_v4 = vld [vmem:[%s1232_s1 + $0x8] sm:$0xff]  ;;  %v911_v6 = vmov 2   ;;  %v204_v7 = vlaneseq }
  0x19   : > { %764 = vset.pattern.permute.xlu1 %v909_v1  ;;  %763 = vset.pattern.permute.xlu0 %v910_v2  ;;  %v199_v5 = vld [vmem:[%s1232_s1] sm:$0xff]  ;;  %s678_s11 = sld [smem:[#allocation3 + $0x3]]  ;;  %p188_p0 = scmp.lt.s32.totalorder %s898_s15, 3 }
  0x1a   : > { %284 = vperm.xlu1 %764, %v202_v0   ;;  %260 = vperm.xlu0 %763, %v202_v0   ;;  %v1004_v8 = vand.u32 127, %v204_v7  ;;  %s195_s18 = sld [smem:[#allocation3]]  ;;  %s912_s29 = smov 377  }
  0x1b   : > { %766 = vset.pattern.permute.xlu2 %v909_v1  ;;  %s676_s19 = sld [smem:[#allocation3 + $0x1]]  ;;  %s185_s30 = sand.u32 1, %s890_s13  }
  0x1c   : > { %280 = vperm.xlu2 %766, %v201_v3   ;;  %v206_v9 = vadd.s32 128, %v1004_v8  ;;  %v207_v10 = vcvt.s32.f32 %v1004_v8  ;;  %s677_s21 = sld [smem:[#allocation3 + $0x2]]  ;;  %s675_s4 = sshll.u32 %s185_s30, 3 }
  0x1d   : > { %s1167_s23 = scalar_select %p188_p0, %s898_s15, 3 }
  0x1e   : > { %v208_v11 = vcvt.s32.f32 %v206_v9  ;;  %s690_s5 = sshll.u32 %s898_s15, 3  ;;  %s187_s9 = scalar_lea.vmem [#allocation6], %s675_s4 }
  0x1f   : > { %v209_v12 = vstv %s678_s11  ;;  %s190_s28 = scalar_lea.vmem %s1233_s2, %s1167_s23  ;;  %s586_s8 = scalar_lea.hbm %s1234_s3, %s690_s5 }
  0x20   : > { %v210_v13 = vsub.f32 %v209_v12, %v207_v10  ;;  %v211_v14 = vsub.f32 %v209_v12, %v208_v11  ;;  %v212_v15 = vstv %s195_s18  ;;  %s588_s10 = sshll.u32 %s187_s9, 4  ;;  %s590_s11 = sshll.u32 %s586_s8, 4  ;;  %s589_s10 = int_to_ptr.vmem [resolvable:$true] %s588_s10  ;;  %s591_s11 = int_to_ptr.hbm [resolvable:$true] %s590_s11 }
  0x21   : > { %v215_v18 = vstv %s676_s19  ;;  %s575_s18 = scalar_lea.sflag [#allocation4], %s185_s30  ;;  %s838_s15 = sshra.s32 %s591_s11, 4  ;;  %s839_s15 = int_to_ptr.hbm [resolvable:$true] %s838_s15 }
  0x22   : > { %765 = vset.pattern.permute.xlu1 %v910_v2  ;;  %255 = vperm.xlu0 %763, %v201_v3   ;;  %v213_v16 = vmul.f32 %v212_v15, %v210_v13  ;;  %v214_v17 = vmul.f32 %v212_v15, %v211_v14  ;;  %v220_v23 = vstv %s677_s21  ;;  %s840_s19 = scalar_lea.hbm %s839_s15, 8  ;;  %s844_s26 = scalar_lea.hbm %s1234_s3, 32 }
  0x23   : > { %250 = vperm.xlu1 %765, %v200_v4   ;;  %p841_p1 = scmp.ne.s32.totalorder %s839_s15, %s840_s19  ;;  %p845_p5 = scmp.lt.s32.totalorder %s839_s15, %s1234_s3 }
  0x24   : > { %767 = vset.pattern.permute.xlu2 %v910_v2  ;;  %v216_v19 = vadd.f32 %v215_v18, %v213_v16  ;;  %v217_v20 = vadd.f32 %v215_v18, %v214_v17  ;;  %p846_p6 = scmp.lt.s32.totalorder %s844_s26, %s840_s19 }
  0x25   : > { %245 = vperm.xlu2 %767, %v199_v5   ;;  %p842_p2 = pnand %p841_p1, %p973_p4 }
  0x26   : > { %v218_v21 = vmul.f32 %v216_v19, %v210_v13  ;;  %v219_v22 = vmul.f32 %v217_v20, %v211_v14  ;;  %p847_p7 = por %p846_p6, %p845_p5 }
  0x27   : > { %p843_p3 = pneg %p842_p2 }
  0x28   : > { %v221_v24 = vadd.f32 %v220_v23, %v218_v21  ;;  %v222_v25 = vadd.f32 %v220_v23, %v219_v22 }
  0x29   : > { %p848_p9 = pnand %p847_p7, %p843_p3 }
  0x2a   : > { %768 = vset.pattern.permute.xlu0 %v909_v1  ;;  %773 = vrsqrt.f32 %v221_v24  ;;  %vm229_vm0 = vweird.f32 %v221_v24  ;;  %vm239_vm2 = vweird.f32 %v222_v25 }
  0x2b   : > { %276 = vperm.xlu0 %768, %v200_v4   ;;  %769 = vset.pattern.permute.xlu1 %v911_v6  ;;  %775 = vrsqrt.f32 %v222_v25 }
  0x2c   : > { %316 = vperm.xlu1 %769, %v202_v0  }
  0x2d   : > { %770 = vset.pattern.permute.xlu2 %v909_v1 }
  0x2e   : > { %272 = vperm.xlu2 %770, %v199_v5  }
  0x30   : > { %v774_v27 = vpop.eup %773 }
  0x31   : > { %v776_v28 = vpop.eup %775  ;;  %v224_v29 = vmul.f32 %v774_v27, %v221_v24  ;;  %vm230_vm1 = vweird.f32 %v774_v27 }
  0x32   : > { %v234_v30 = vmul.f32 %v776_v28, %v222_v25  ;;  %vm240_vm3 = vweird.f32 %v776_v28  ;;  %vm231_vm4 = vmor %vm229_vm0, %vm230_vm1 }
  0x33   : > { %772 = vset.pattern.permute.xlu0 %v911_v6  ;;  %v225_v31 = vmul.f32 %v774_v27, %v224_v29  ;;  %vm241_vm5 = vmor %vm239_vm2, %vm240_vm3 }
  0x34   : > { %312 = vperm.xlu1 %769, %v201_v3   ;;  %304 = vperm.xlu0 %772, %v199_v5   ;;  %v235_v32 = vmul.f32 %v776_v28, %v234_v30 }
  0x35   : > { %v226_v36 = vmul.f32 0.5, %v225_v31 }
  0x36   : > { %771 = vset.pattern.permute.xlu2 %v911_v6  ;;  %v236_v37 = vmul.f32 0.5, %v235_v32 }
  0x37   : > { %308 = vperm.xlu2 %771, %v200_v4   ;;  %v227_v38 = vsub.f32 1.5, %v226_v36 }
  0x38   : > { %v237_v39 = vsub.f32 1.5, %v236_v37 }
  0x39   : > { %v228_v45 = vmul.f32 %v774_v27, %v227_v38 }
  0x3a   : > { %v238_v46 = vmul.f32 %v776_v28, %v237_v39 }
  0x3b   : > { %v232_v49 = vsel %vm231_vm4, %v774_v27, %v228_v45 }
  0x3c   : > { %v242_v50 = vsel %vm241_vm5, %v776_v28, %v238_v46 }
  0x76   : > { %v281_v26 = vpop.permute.xlu2 %280 }
  0x7f   : > { %v246_v33 = vpop.permute.xlu2 %245 }
  0x80   : > { %v263_v61 = vmul.f32 %v246_v33, %v210_v13  ;;  %v264_v1 = vmul.f32 %v246_v33, %v211_v14 }
  0x88   : > { %v273_v44 = vpop.permute.xlu2 %272 }
  0x89   : > { %v287_v12 = vadd.f32 %v273_v44, %v263_v61 }
  0x8b   : > { %v295_v22 = vmul.f32 %v287_v12, %v232_v49 }
  0x8c   : > { %v285_v34 = vpop.permute.xlu1 %284  ;;  %v261_v35 = vpop.permute.xlu0 %260 }
  0x8d   : > { %v269_v41 = vmul.f32 %v261_v35, %v210_v13  ;;  %v270_v42 = vmul.f32 %v261_v35, %v211_v14 }
  0x8f   : > { %v293_v47 = vadd.f32 %v285_v34, %v269_v41  ;;  %v294_v48 = vadd.f32 %v285_v34, %v270_v42 }
  0x91   : > { %v301_v56 = vmul.f32 %v293_v47, %v232_v49  ;;  %v302_v57 = vmul.f32 %v294_v48, %v242_v50  ;;  %v309_v0 = vpop.permute.xlu2 %308 }
  0x94   : > { %v256_v40 = vpop.permute.xlu0 %255 }
  0x95   : > { %v251_v43 = vpop.permute.xlu1 %250  ;;  %v267_v53 = vmul.f32 %v256_v40, %v210_v13  ;;  %v268_v54 = vmul.f32 %v256_v40, %v211_v14 }
  0x96   : > { %v265_v51 = vmul.f32 %v251_v43, %v210_v13  ;;  %v266_v52 = vmul.f32 %v251_v43, %v211_v14  ;;  %v288_v13 = vadd.f32 %v273_v44, %v264_v1 }
  0x97   : > { %v291_v4 = vadd.f32 %v281_v26, %v267_v53  ;;  %v292_v5 = vadd.f32 %v281_v26, %v268_v54 }
  0x98   : > { %v296_v23 = vmul.f32 %v288_v13, %v242_v50 }
  0x99   : > { %v299_v16 = vmul.f32 %v291_v4, %v232_v49  ;;  %v300_v17 = vmul.f32 %v292_v5, %v242_v50 }
  0x9d   : > { %v277_v55 = vpop.permute.xlu0 %276 }
  0x9e   : > { %v289_v58 = vadd.f32 %v277_v55, %v265_v51  ;;  %v290_v59 = vadd.f32 %v277_v55, %v266_v52  ;;  %v317_v60 = vpop.permute.xlu1 %316 }
  0x9f   : > { %v1008_v62 = vadd.f32 %v317_v60, %v301_v56  ;;  %v1010_v63 = vadd.f32 %v317_v60, %v302_v57 }
  0xa0   : > { %v297_v2 = vmul.f32 %v289_v58, %v232_v49  ;;  %v298_v3 = vmul.f32 %v290_v59, %v242_v50 }
  0xa1   : > { %v685_v6 = vmul.f32 -1.442695, %v1008_v62  ;;  %v686_v9 = vmul.f32 -1.442695, %v1010_v63 }
  0xa2   : > { %v1014_v10 = vadd.f32 %v309_v0, %v297_v2  ;;  %v1016_v11 = vadd.f32 %v309_v0, %v298_v3 }
  0xa3   : > { %777 = vpow2.f32 %v685_v6 }
  0xa4   : > { %779 = vpow2.f32 %v686_v9  ;;  %v681_v15 = vmul.f32 -1.442695, %v1014_v10  ;;  %v682_v14 = vmul.f32 -1.442695, %v1016_v11 }
  0xa6   : > { %781 = vpow2.f32 %v681_v15  ;;  %v313_v18 = vpop.permute.xlu1 %312  ;;  %v305_v19 = vpop.permute.xlu0 %304 }
  0xa7   : > { %783 = vpow2.f32 %v682_v14  ;;  %v1020_v20 = vadd.f32 %v313_v18, %v299_v16  ;;  %v1022_v21 = vadd.f32 %v313_v18, %v300_v17  ;;  %v1025_v26 = vadd.f32 %v305_v19, %v295_v22 }
  0xa8   : > { %v1030_v30 = vadd.f32 %v305_v19, %v296_v23 }
  0xa9   : > { %v778_v24 = vpop.eup %777  ;;  %v683_v25 = vmul.f32 -1.442695, %v1020_v20  ;;  %v684_v29 = vmul.f32 -1.442695, %v1022_v21  ;;  %v679_v35 = vmul.f32 -1.442695, %v1025_v26 }
  0xaa   : > { %v780_v27 = vpop.eup %779  ;;  %v1027_v28 = vadd.f32 1.0, %v778_v24  ;;  %v680_v37 = vmul.f32 -1.442695, %v1030_v30 }
  0xab   : > { %v1032_v31 = vadd.f32 1.0, %v780_v27  ;;  %785 = vpow2.f32 %v683_v25  ;;  %v203_v25 = vld [vmem:[%s190_s28] sm:$0x1] }
  0xac   : > { %v782_v32 = vpop.eup %781  ;;  %787 = vrcp.f32 %v1027_v28  ;;  %v458_v38 = vand.u32 2147483647, %v1027_v28  ;;  %v460_v39 = vand.u32 2147483648, %v1027_v28  ;;  %vm454_vm6 = vweird.f32 %v1027_v28 }
  0xad   : > { %v784_v33 = vpop.eup %783  ;;  %789 = vrcp.f32 %v1032_v31  ;;  %v1036_v34 = vadd.f32 1.0, %v782_v32  ;;  %v473_v40 = vand.u32 2147483647, %v1032_v31  ;;  %v475_v42 = vand.u32 2147483648, %v1032_v31 }
  0xae   : > { %v1039_v36 = vadd.f32 1.0, %v784_v33  ;;  %791 = vpow2.f32 %v684_v29  ;;  %vm1053_vm7 = vcmp.eq.f32.partialorder %v458_v38, 8.507059e+37  ;;  %v461_v49 = vor.u32 1.1754944e-38, %v460_v39 }
  0xaf   : > { %793 = vrcp.f32 %v1036_v34  ;;  %v400_v45 = vand.u32 2147483648, %v1036_v34  ;;  %vm469_vm8 = vweird.f32 %v1032_v31  ;;  %vm1060_vm9 = vcmp.eq.f32.partialorder %v473_v40, 8.507059e+37 }
  0xb0   : > { %795 = vrcp.f32 %v1039_v36  ;;  %v415_v53 = vand.u32 2147483648, %v1039_v36  ;;  %v476_v57 = vor.u32 1.1754944e-38, %v475_v42  ;;  %v398_v58 = vand.u32 2147483647, %v1036_v34 }
  0xb1   : > { %v786_v41 = vpop.eup %785  ;;  %797 = vpow2.f32 %v679_v35  ;;  %vm394_vm10 = vweird.f32 %v1036_v34  ;;  %v1075_v0 = vor.u32 1.1754944e-38, %v400_v45  ;;  %v413_v1 = vand.u32 2147483647, %v1039_v36 }
  0xb2   : > { %v788_v43 = vpop.eup %787  ;;  %v1048_v44 = vadd.f32 1.0, %v786_v41  ;;  %799 = vpow2.f32 %v680_v37  ;;  %v1082_v12 = vor.u32 1.1754944e-38, %v415_v53  ;;  %vm1092_vm0 = vcmp.eq.f32.partialorder %v398_v58, 8.507059e+37 }
  0xb3   : > { %v790_v46 = vpop.eup %789  ;;  %v450_v47 = vmul.f32 %v788_v43, %v1027_v28  ;;  %vm455_vm11 = vweird.f32 %v788_v43  ;;  %vm409_vm1 = vweird.f32 %v1039_v36  ;;  %vm1119_vm4 = vcmp.eq.f32.partialorder %v413_v1, 8.507059e+37 }
  0xb4   : > { %v792_v50 = vpop.eup %791  ;;  %801 = vrcp.f32 %v1048_v44  ;;  %v465_v51 = vmul.f32 %v790_v46, %v1032_v31  ;;  %v428_v4 = vand.u32 2147483647, %v1048_v44  ;;  %vm470_vm12 = vweird.f32 %v790_v46  ;;  %vm456_vm14 = vmor %vm454_vm6, %vm455_vm11 }
  0xb5   : > { %v1065_v54 = vpop.eup %793  ;;  %v1067_v55 = vadd.f32 1.0, %v792_v50  ;;  %v451_v56 = vsub.f32 1.0, %v450_v47  ;;  %vm424_vm13 = vweird.f32 %v1048_v44  ;;  %v430_v14 = vand.u32 2147483648, %v1048_v44  ;;  %vm471_vm2 = vmor %vm469_vm8, %vm470_vm12 }
  0xb6   : > { %v1070_v59 = vpop.eup %795  ;;  %v466_v60 = vsub.f32 1.0, %v465_v51  ;;  %v390_v61 = vmul.f32 %v1065_v54, %v1036_v34  ;;  %vm395_vm15 = vweird.f32 %v1065_v54  ;;  %vm1104_vm3 = vcmp.eq.f32.partialorder %v428_v4, 8.507059e+37 }
  0xb7   : > { %v798_v2 = vpop.eup %797  ;;  %803 = vrcp.f32 %v1067_v55  ;;  %v452_v3 = vmul.f32 %v788_v43, %v451_v56  ;;  %v405_v22 = vmul.f32 %v1070_v59, %v1039_v36  ;;  %v443_v29 = vand.u32 2147483647, %v1067_v55  ;;  %vm1127_vm6 = vmor %vm394_vm10, %vm395_vm15 }
  0xb8   : > { %v800_v5 = vpop.eup %799  ;;  %v1080_v6 = vadd.f32 1.0, %v798_v2  ;;  %v467_v9 = vmul.f32 %v790_v46, %v466_v60  ;;  %v391_v16 = vsub.f32 1.0, %v390_v61  ;;  %v445_v41 = vand.u32 2147483648, %v1067_v55 }
  0xb9   : > { %v1084_v13 = vadd.f32 1.0, %v800_v5  ;;  %v453_v15 = vadd.f32 %v788_v43, %v452_v3  ;;  %v406_v38 = vsub.f32 1.0, %v405_v22  ;;  %v431_v45 = vor.u32 1.1754944e-38, %v430_v14 }
  0xba   : > { %v802_v17 = vpop.eup %801  ;;  %805 = vrcp.f32 %v1080_v6  ;;  %v468_v18 = vadd.f32 %v790_v46, %v467_v9  ;;  %v392_v32 = vmul.f32 %v1065_v54, %v391_v16  ;;  %vm410_vm8 = vweird.f32 %v1070_v59 }
  0xbb   : > { %807 = vrcp.f32 %v1084_v13  ;;  %v457_v23 = vsel %vm456_vm14, %v788_v43, %v453_v15  ;;  %v420_v24 = vmul.f32 %v802_v17, %v1048_v44  ;;  %vm425_vm5 = vweird.f32 %v802_v17  ;;  %vm1153_vm12 = vmor %vm409_vm1, %vm410_vm8 }
  0xbc   : > { %v462_v27 = vsel %vm1053_vm7, %v461_v49, %v457_v23  ;;  %v472_v28 = vsel %vm471_vm2, %v790_v46, %v468_v18  ;;  %v393_v42 = vadd.f32 %v1065_v54, %v392_v32  ;;  %v407_v46 = vmul.f32 %v1070_v59, %v406_v38  ;;  %vm426_vm10 = vmor %vm424_vm13, %vm425_vm5 }
  0xbd   : > { %v804_v33 = vpop.eup %803  ;;  %v485_v35 = vmul.f32 %v462_v27, %v1008_v62  ;;  %v477_v31 = vsel %vm1060_vm9, %v476_v57, %v472_v28  ;;  %v421_v37 = vsub.f32 1.0, %v420_v24  ;;  %vm439_vm7 = vweird.f32 %v1067_v55 }
  0xbe   : > { %v486_v39 = vmul.f32 %v477_v31, %v1010_v63  ;;  %v435_v40 = vmul.f32 %v804_v33, %v1067_v55  ;;  %v397_v49 = vsel %vm1127_vm6, %v1065_v54, %v393_v42  ;;  %vm1138_vm9 = vcmp.eq.f32.partialorder %v443_v29, 8.507059e+37 }
  0xbf   : > { %503 = vmatpush.msra.mxu0 %v485_v35  ;;  %v422_v62 = vmul.f32 %v802_v17, %v421_v37  ;;  %v408_v52 = vadd.f32 %v1070_v59, %v407_v46  ;;  %vm440_vm11 = vweird.f32 %v804_v33  ;;  %v446_v56 = vor.u32 1.1754944e-38, %v445_v41 }
  0xc0   : > { %v806_v47 = vpop.eup %805  ;;  %523 = vmatpush.msra.mxu1 %v486_v39  ;;  %v436_v48 = vsub.f32 1.0, %v435_v40  ;;  %v370_v57 = vand.u32 2147483648, %v1080_v6  ;;  %v402_v60 = vsel %vm1092_vm0, %v1075_v0, %v397_v49  ;;  %vm364_vm14 = vweird.f32 %v1080_v6  ;;  %vm441_vm13 = vmor %vm439_vm7, %vm440_vm11 }
  0xc1   : > { %v808_v50 = vpop.eup %807  ;;  %v423_v34 = vadd.f32 %v802_v17, %v422_v62  ;;  %v360_v53 = vmul.f32 %v806_v47, %v1080_v6  ;;  %v412_v3 = vsel %vm1153_vm12, %v1070_v59, %v408_v52  ;;  %vm365_vm15 = vweird.f32 %v806_v47 }
  0xc2   : > { %v437_v54 = vmul.f32 %v804_v33, %v436_v48  ;;  %v375_v4 = vmul.f32 %v808_v50, %v1084_v13  ;;  %v368_v5 = vand.u32 2147483647, %v1080_v6  ;;  %v481_v15 = vmul.f32 %v402_v60, %v1014_v10  ;;  %vm366_vm0 = vmor %vm364_vm14, %vm365_vm15 }
  0xc3   : > { %v427_v58 = vsel %vm426_vm10, %v802_v17, %v423_v34  ;;  %v361_v1 = vsub.f32 1.0, %v360_v53  ;;  %v371_v14 = vor.u32 1.1754944e-38, %v370_v57  ;;  %v385_v17 = vand.u32 2147483648, %v1084_v13 }
  0xc4   : > { %v432_v44 = vsel %vm1104_vm3, %v431_v45, %v427_v58  ;;  %v438_v2 = vadd.f32 %v804_v33, %v437_v54  ;;  %v376_v59 = vsub.f32 1.0, %v375_v4  ;;  %vm380_vm1 = vweird.f32 %v808_v50 }
  0xc5   : > { %v483_v36 = vmul.f32 %v432_v44, %v1020_v20  ;;  %v362_v0 = vmul.f32 %v806_v47, %v361_v1  ;;  %v417_v20 = vsel %vm1119_vm4, %v1082_v12, %v412_v3  ;;  %v383_v10 = vand.u32 2147483647, %v1084_v13 }
  0xc6   : > { %v442_v9 = vsel %vm441_vm13, %v804_v33, %v438_v2  ;;  %v377_v19 = vmul.f32 %v808_v50, %v376_v59  ;;  %vm369_vm2 = vcmp.eq.f32.partialorder %v368_v5, 8.507059e+37  ;;  %v482_v12 = vmul.f32 %v417_v20, %v1016_v11 }
  0xc7   : > { %504 = vmatpush.msra.mxu0 %v483_v36  ;;  %v447_v16 = vsel %vm1138_vm9, %v446_v56, %v442_v9  ;;  %v363_v55 = vadd.f32 %v806_v47, %v362_v0  ;;  %vm379_vm3 = vweird.f32 %v1084_v13  ;;  %v386_v6 = vor.u32 1.1754944e-38, %v385_v17 }
  0xc8   : > { %v484_v18 = vmul.f32 %v447_v16, %v1022_v21  ;;  %v378_v24 = vadd.f32 %v808_v50, %v377_v19  ;;  %vm381_vm4 = vmor %vm379_vm3, %vm380_vm1  ;;  %vm487_vm5 = vcmask 261120   ;;  %vm384_vm6 = vcmp.eq.f32.partialorder %v383_v10, 8.507059e+37 }
  0xc9   : > { %505 = vmatpush.msra.mxu0 %v481_v15  ;;  %v367_v22 = vsel %vm366_vm0, %v806_v47, %v363_v55  ;;  %v561_v33 = vshrl.u32 %v204_v7, 7  ;;  %vm572_vm8 = vcmask 64512  }
  0xca   : > { %524 = vmatpush.msra.mxu1 %v484_v18  ;;  %v372_v23 = vsel %vm369_vm2, %v371_v14, %v367_v22  ;;  %v382_v27 = vsel %vm381_vm4, %v808_v50, %v378_v24 }
  0xcb   : > { %v479_v21 = vmul.f32 %v372_v23, %v1025_v26  ;;  %v387_v28 = vsel %vm384_vm6, %v386_v6, %v382_v27  ;;  %v562_v35 = vadd.s32 121, %v561_v33 }
  0xcc   : > { %525 = vmatpush.msra.mxu1 %v482_v12  ;;  %v480_v29 = vmul.f32 %v387_v28, %v1030_v30 }
  0xcd   : > { %506 = vmatpush.msra.mxu0 %v479_v21  ;;  %vm565_vm7 = vcmp.lt.s32.totalorder %v1004_v8, %v562_v35 }
  0xce   : > { %687 = vmatmul.msk.f32.vlgmr.msra.gmra.mxu0 %vm487_vm5, %v203_v25  ;;  %526 = vmatpush.msra.mxu1 %v480_v29 }
  0xcf   : > { %688 = vmatmul.msk.f32.vlgmr.msra.gmra.mxu1 %vm487_vm5, %v203_v25 }
 0x14b   : > { %v508_v11 = vpop.f32.mrf.mxu0 }
 0x14c   : > { %v531_v13 = vperm.slane %v508_v11, 0  ;;  %v528_v26 = vpop.f32.mrf.mxu1 }
 0x14d   : > { %v532_v32 = vperm.slane %v528_v26, 0 }
 0x14e   : > { %552 = vrot.lane.b32.xlu1 %v531_v13, %s912_s29 }
 0x14f   : > { %557 = vrot.lane.b32.xlu2 %v532_v32, %s912_s29 }
 0x1a9   : > { %v558_v30 = vpop.permute.xlu2 %557 }
 0x1c0   : > { %v553_v31 = vpop.permute.xlu1 %552 }
 0x1c1   : > { %v566_v37 = vsel %vm565_vm7, %v553_v31, %v558_v30 }
 0x1c2   : > { %573 = vst.msk [vmem:[%s187_s9] sm:$0xff] %vm572_vm8, %v566_v37 }
 0x1c3   : > { %851 = shalt.err (!%p848_p9)
}
 0x1c4   : > { %697 = dma.vmem_to_hbm [thread:$0]  (%p973_p4), %s589_s10, 128, %s591_s11, %s575_s18  }
 0x1c5 PF: > { %p709_p10 = scmp.ge.s32.totalorder %s906_s17, 2  ;;  %s602_s29 = sand.u32 1, %s886_s12  }
 0x1c6   : > { %s603_s30 = scalar_lea.sflag [#allocation4], %s602_s29 }
 0x1c7   : > { %p704_p11 = pnand %p709_p10, %p980_p8 }
 0x1c9   : > { %p705_p12 = pneg %p704_p11 }
 0x1cb   : > { %881 = dma.done.wait (%p705_p12), %s603_s30, 128  }
 0x1cc   : > { %883 = vsyncadd (%p705_p12), %s603_s30, 4294967168  ;;  %s17_s17 = sadd.s32 1, %s906_s17   ;;  %s1253_s12 = smov %s890_s13 }
 0x1cd   : > { %p14_p13 = scmp.ge.s32.totalorder %s17_s17, 6   ;;  %s1254_s13 = smov %s894_s14 }
 0x1ce   : > { %s1255_s14 = smov %s986_s25  ;;  %s1256_s15 = smov %s902_s16 }
 0x1cf   : > { %s1257_s16 = smov %s1259_s20  ;;  %16 = sbr.rel (!%p14_p13) target bundleno = 5 (0x5), region = 76 }
 0x1d4   :  { %609 = vsyncpa [#allocation4], 1 }
 0x1d5   :  { %611 = vsyncpa [#allocation4 + $0x1], 1 }
 0x1d6   :  { %612 = vsyncpa [#allocation5], 1 }
 0x1d7   :  { %614 = vsyncpa [#allocation5 + $0x1], 1 }

</bundles_post_ra>
